<compile_context>
chip_gen: v6e
topology: v6e:2x2x1
jax: 0.10.0
libtpu: 0.0.40
codegen_flags: <defaults>
</compile_context>

<pallas_src>
import functools

import jax
import jax.numpy as jnp
from jax import lax
from jax.experimental import pallas as pl
from jax.experimental.pallas import tpu as pltpu

_LANE = 128
_SUBLANE = 8


def _round_up(x, m):
    return ((x + m - 1) // m) * m


def _milk_item_emb_kernel(feat_ref, w_ref, b_ref, out_ref, *, d_img, m_item, tm):
    """Fused: per-segment L2 row-normalize -> MXU matmul(s) -> +bias.

    feat_ref : (tm, d_cat)     concatenated raw [image | text | 0-pad] features, f32
    w_ref    : (d_cat, emb)    [w_img; w_txt; 0] * 0.5, dtype = matmul dtype
    b_ref    : (1, emb)        (b_img + b_txt) * 0.5, f32
    out_ref  : (tm, emb)       f32 output tile (partial last block -> masked store)
    """
    eps2 = 1e-12 * 1e-12  # torch F.normalize: 1/max(||x||,eps) == rsqrt(max(sum x^2, eps^2))

    feat = feat_ref[...]  # (tm, d_cat) f32

    # Zero the garbage tail rows of a partial last block so they cannot produce
    # Inf/NaN (those rows are discarded by the masked OOB output store anyway).
    if m_item % tm != 0:
        row = lax.broadcasted_iota(jnp.int32, (feat.shape[0], 1), 0) + pl.program_id(0) * tm
        feat = jnp.where(row < m_item, feat, 0.0)

    w = w_ref[...]  # (d_cat, emb), possibly bf16 (pre-cast in wrapper)

    if d_img % _LANE == 0:
        # Image/text segments are lane-tile aligned: static slices, no iota/where.
        img = feat[:, :d_img]
        txt = feat[:, d_img:]  # includes any zero K-padding lanes (harmless)
        inv_i = lax.rsqrt(jnp.maximum(jnp.sum(img * img, axis=-1, keepdims=True), eps2))
        inv_t = lax.rsqrt(jnp.maximum(jnp.sum(txt * txt, axis=-1, keepdims=True), eps2))
        img_n = (img * inv_i).astype(w.dtype)
        txt_n = (txt * inv_t).astype(w.dtype)
        acc = jnp.dot(img_n, w[:d_img, :], preferred_element_type=jnp.float32)
        acc = acc + jnp.dot(txt_n, w[d_img:, :], preferred_element_type=jnp.float32)
    else:
        # Generic path: one iota/select + total-minus-image (one masked reduce).
        lane = lax.broadcasted_iota(jnp.int32, feat.shape, 1)
        is_img = lane < d_img
        sq = feat * feat
        img_ss = jnp.sum(jnp.where(is_img, sq, 0.0), axis=-1, keepdims=True)
        txt_ss = jnp.sum(sq, axis=-1, keepdims=True) - img_ss
        inv = jnp.where(is_img,
                        lax.rsqrt(jnp.maximum(img_ss, eps2)),
                        lax.rsqrt(jnp.maximum(txt_ss, eps2)))
        feat_n = (feat * inv).astype(w.dtype)
        acc = jnp.dot(feat_n, w, preferred_element_type=jnp.float32)

    out_ref[...] = (acc + b_ref[...]).astype(out_ref.dtype)


@functools.partial(jax.jit, static_argnames=("tm", "matmul_dtype"))
def milk_item_emb(feat_cat, w_img, b_img, w_txt, b_txt, *, tm=None,
                  matmul_dtype=jnp.float32):
    """item_emb = (normalize(img) @ w_img + b_img + normalize(txt) @ w_txt + b_txt) / 2.

    feat_cat is the pre-concatenated (and K-lane-padded) [m_item, d_cat] raw feature
    array.  Weights are stored pre-transposed as [D_in, E] so the kernel does X @ W.
    """
    m_item, d_cat = feat_cat.shape
    d_img, emb_dim = w_img.shape
    d_txt = w_txt.shape[0]
    assert d_cat >= d_img + d_txt

    # Fuse the two linears (fold the 0.5 average + both biases); zero-pad weight rows
    # to match feat_cat's K padding.  Tiny one-off work under jit (weights are small).
    w_cat = jnp.concatenate([w_img, w_txt], axis=0) * 0.5        # (d_img+d_txt, emb)
    if d_cat > d_img + d_txt:
        w_cat = jnp.pad(w_cat, ((0, d_cat - (d_img + d_txt)), (0, 0)))
    w_cat = w_cat.astype(matmul_dtype)                           # (d_cat, emb)
    b_cat = ((b_img + b_txt) * 0.5).astype(jnp.float32)          # (1, emb)

    # Row tiling: no host-side pad copy; ragged tail handled as a partial block.
    # Aim for >= 2 grid steps (both v7x TensorCores) with the largest tile that
    # amortizes the ~0.35us per-step overhead; cap 2048 keeps double-buffered tiles
    # (~4 MiB feat + <1 MiB out) far below every generation's scoped-VMEM default.
    if tm is None:
        tm = min(2048, max(_SUBLANE, _round_up(pl.cdiv(m_item, 2), _SUBLANE)))
    grid = (pl.cdiv(m_item, tm),)

    kernel = functools.partial(_milk_item_emb_kernel, d_img=d_img, m_item=m_item, tm=tm)
    return pl.pallas_call(
        kernel,
        out_shape=jax.ShapeDtypeStruct((m_item, emb_dim), jnp.float32),
        grid_spec=pltpu.PrefetchScalarGridSpec(
            num_scalar_prefetch=0,
            grid=grid,
            in_specs=[
                pl.BlockSpec((tm, d_cat), lambda i: (i, 0)),        # feature row tile
                pl.BlockSpec((d_cat, emb_dim), lambda i: (0, 0)),   # fused weight (resident)
                pl.BlockSpec((1, emb_dim), lambda i: (0, 0)),       # fused bias (resident)
            ],
            out_specs=pl.BlockSpec((tm, emb_dim), lambda i: (i, 0)),
        ),
        compiler_params=pltpu.CompilerParams(
            dimension_semantics=("parallel",)),
    )(feat_cat, w_cat, b_cat)


def milk_forward(params, *, matmul_dtype=jnp.float32):
    """Equivalent of MILK_model.forward(): returns (user_emb, item_emb)."""
    user_emb = params["user_emb"]                                 # returned untouched
    item_emb = milk_item_emb(
        params["feat_cat"],
        params["w_img"], params["b_img"],
        params["w_txt"], params["b_txt"],
        matmul_dtype=matmul_dtype,
    )
    return user_emb, item_emb


def init_params(key, n_user=32, m_item=64, d_img=128, d_txt=64, emb_dim=32):
    """Deterministic synthetic parameter/feature init (mirrors module __init__ shapes)."""
    ks = jax.random.split(key, 7)
    # raw (un-normalized) features; the kernel performs the L2 row normalization
    image_feat = jax.random.normal(ks[0], (m_item, d_img), jnp.float32)
    text_feat = jax.random.normal(ks[1], (m_item, d_txt), jnp.float32)
    # One-time preprocessing (the __init__ analogue): concatenate raw features and
    # zero-pad K to whole 128-lane tiles so every kernel feature vreg is dense.
    d_raw = d_img + d_txt
    d_cat = _round_up(d_raw, _LANE)
    feat_cat = jnp.concatenate([image_feat, text_feat], axis=1)
    if d_cat != d_raw:
        feat_cat = jnp.pad(feat_cat, ((0, 0), (0, d_cat - d_raw)))
    # user embedding: normal(std=0.1) as in torch.nn.init.normal_(..., std=0.1)
    user_emb = 0.1 * jax.random.normal(ks[2], (n_user, emb_dim), jnp.float32)
    # nn.Linear-style init (uniform in [-1/sqrt(fan_in), 1/sqrt(fan_in)]),
    # weights stored pre-transposed as [D_in, E]
    lim_i = 1.0 / jnp.sqrt(jnp.float32(d_img))
    lim_t = 1.0 / jnp.sqrt(jnp.float32(d_txt))
    w_img = jax.random.uniform(ks[3], (d_img, emb_dim), jnp.float32, -lim_i, lim_i)
    b_img = jax.random.uniform(ks[4], (1, emb_dim), jnp.float32, -lim_i, lim_i)
    w_txt = jax.random.uniform(ks[5], (d_txt, emb_dim), jnp.float32, -lim_t, lim_t)
    b_txt = jax.random.uniform(ks[6], (1, emb_dim), jnp.float32, -lim_t, lim_t)
    return dict(image_feat=image_feat, text_feat=text_feat, feat_cat=feat_cat,
                user_emb=user_emb,
                w_img=w_img, b_img=b_img, w_txt=w_txt, b_txt=b_txt)


def _reference(params):
    """Pure-JAX reference for correctness check."""
    def norm(x):
        return x / jnp.maximum(jnp.linalg.norm(x, axis=1, keepdims=True), 1e-12)
    img = norm(params["image_feat"]) @ params["w_img"] + params["b_img"]
    txt = norm(params["text_feat"]) @ params["w_txt"] + params["b_txt"]
    return params["user_emb"], (img + txt) * 0.5


if __name__ == "__main__":
    key = jax.random.PRNGKey(0)

    # Config A: lane-aligned image segment (d_img % 128 == 0) and a ragged row tail
    # (m_item % tm != 0) -> exercises the static-slice path + partial-block masking.
    params = init_params(key, n_user=32, m_item=70, d_img=128, d_txt=64, emb_dim=32)
    user_emb, item_emb = jax.block_until_ready(milk_forward(params))
    ref_user, ref_item = _reference(params)
    assert user_emb.shape == (32, 32) and item_emb.shape == (70, 32)
    assert jnp.allclose(user_emb, ref_user)
    assert jnp.allclose(item_emb, ref_item, atol=2e-5, rtol=2e-5)
    assert not bool(jnp.isnan(item_emb).any())
    assert not bool(jnp.isnan(user_emb).any())

    # bf16 MXU operands (normalization stays f32); looser tolerance for bf16 rounding.
    _, item_bf16 = jax.block_until_ready(
        milk_forward(params, matmul_dtype=jnp.bfloat16))
    assert jnp.allclose(item_bf16, ref_item, atol=1e-2, rtol=5e-2)
    assert not bool(jnp.isnan(item_bf16).any())

    # Config B: d_img not a multiple of 128 -> exercises the iota/where fallback path.
    params_b = init_params(jax.random.PRNGKey(1), n_user=16, m_item=48,
                           d_img=96, d_txt=64, emb_dim=32)
    _, item_b = jax.block_until_ready(milk_forward(params_b))
    _, ref_b = _reference(params_b)
    assert item_b.shape == (48, 32)
    assert jnp.allclose(item_b, ref_b, atol=2e-5, rtol=2e-5)
    assert not bool(jnp.isnan(item_b).any())

    print("KERNEL_OK")
</pallas_src>

<mosaic_0001>
module attributes {stable_mosaic.version = 11 : i64} {
  func.func @_milk_item_emb_kernel(%arg0: i32, %arg1: memref<40x256xf32, #tpu.memory_space<vmem>>, %arg2: memref<256x32xf32, #tpu.memory_space<vmem>>, %arg3: memref<1x32xf32, #tpu.memory_space<vmem>>, %arg4: memref<40x32xf32, #tpu.memory_space<vmem>>) attributes {dimension_semantics = [#tpu.dimension_semantics<parallel>], iteration_bounds = array<i64: 2>, scalar_prefetch = 0 : i64, scratch_operands = 0 : i64, tpu.core_type = #tpu.core_type<tc>, window_params = [{transform_indices = @transform_0, window_bounds = array<i64: 40, 256>}, {pipeline_mode = #tpu.pipeline_mode<synchronous>, transform_indices = @transform_1, window_bounds = array<i64: 256, 32>}, {pipeline_mode = #tpu.pipeline_mode<synchronous>, transform_indices = @transform_2, window_bounds = array<i64: 1, 32>}, {transform_indices = @transform_3, window_bounds = array<i64: 40, 32>}]} {
    %c0 = arith.constant 0 : index
    %c0_0 = arith.constant 0 : index
    %0 = vector.load %arg1[%c0, %c0_0] : memref<40x256xf32, #tpu.memory_space<vmem>>, vector<40x256xf32>
    %1 = tpu.iota {dimensions = array<i32: 0>} : vector<40x1xi32>
    %c40_i32 = arith.constant 40 : i32
    %2 = arith.muli %arg0, %c40_i32 : i32
    %3 = vector.broadcast %2 : i32 to vector<40x1xi32>
    %4 = arith.addi %1, %3 : vector<40x1xi32>
    %c70_i32 = arith.constant 70 : i32
    %5 = vector.broadcast %c70_i32 : i32 to vector<40x1xi32>
    %6 = arith.cmpi slt, %4, %5 : vector<40x1xi32>
    %cst = arith.constant 0.000000e+00 : f32
    %7 = vector.shape_cast %6 : vector<40x1xi1> to vector<40x1xi1>
    %8 = vector.broadcast %7 : vector<40x1xi1> to vector<40x256xi1>
    %9 = vector.broadcast %cst : f32 to vector<40x256xf32>
    %10 = arith.select %8, %0, %9 : vector<40x256xi1>, vector<40x256xf32>
    %c0_1 = arith.constant 0 : index
    %c0_2 = arith.constant 0 : index
    %11 = vector.load %arg2[%c0_1, %c0_2] : memref<256x32xf32, #tpu.memory_space<vmem>>, vector<256x32xf32>
    %12 = vector.extract_strided_slice %10 {offsets = [0, 0], sizes = [40, 128], strides = [1, 1]} : vector<40x256xf32> to vector<40x128xf32>
    %13 = vector.extract_strided_slice %10 {offsets = [0, 128], sizes = [40, 128], strides = [1, 1]} : vector<40x256xf32> to vector<40x128xf32>
    %14 = arith.mulf %12, %12 : vector<40x128xf32>
    %cst_3 = arith.constant dense<0.000000e+00> : vector<40xf32>
    %15 = vector.multi_reduction <add>, %14, %cst_3 [1] : vector<40x128xf32> to vector<40xf32>
    %16 = vector.shape_cast %15 : vector<40xf32> to vector<40x1xf32>
    %cst_4 = arith.constant 1.000000e-24 : f32
    %17 = vector.broadcast %cst_4 : f32 to vector<40x1xf32>
    %18 = arith.maximumf %16, %17 : vector<40x1xf32>
    %19 = math.rsqrt %18 : vector<40x1xf32>
    %20 = arith.mulf %13, %13 : vector<40x128xf32>
    %cst_5 = arith.constant dense<0.000000e+00> : vector<40xf32>
    %21 = vector.multi_reduction <add>, %20, %cst_5 [1] : vector<40x128xf32> to vector<40xf32>
    %22 = vector.shape_cast %21 : vector<40xf32> to vector<40x1xf32>
    %cst_6 = arith.constant 1.000000e-24 : f32
    %23 = vector.broadcast %cst_6 : f32 to vector<40x1xf32>
    %24 = arith.maximumf %22, %23 : vector<40x1xf32>
    %25 = math.rsqrt %24 : vector<40x1xf32>
    %26 = vector.broadcast %19 : vector<40x1xf32> to vector<40x128xf32>
    %27 = arith.mulf %12, %26 : vector<40x128xf32>
    %28 = vector.broadcast %25 : vector<40x1xf32> to vector<40x128xf32>
    %29 = arith.mulf %13, %28 : vector<40x128xf32>
    %30 = vector.extract_strided_slice %11 {offsets = [0, 0], sizes = [128, 32], strides = [1, 1]} : vector<256x32xf32> to vector<128x32xf32>
    %cst_7 = arith.constant dense<0.000000e+00> : vector<40x32xf32>
    %31 = tpu.matmul %27, %30, %cst_7 {dimension_numbers = #tpu.dot_dimension_numbers<[1], [0], [0], [1], [0, 0, 1, 1], [], []>} : vector<40x128xf32>, vector<128x32xf32>, vector<40x32xf32> -> vector<40x32xf32>
    %32 = vector.extract_strided_slice %11 {offsets = [128, 0], sizes = [128, 32], strides = [1, 1]} : vector<256x32xf32> to vector<128x32xf32>
    %cst_8 = arith.constant dense<0.000000e+00> : vector<40x32xf32>
    %33 = tpu.matmul %29, %32, %cst_8 {dimension_numbers = #tpu.dot_dimension_numbers<[1], [0], [0], [1], [0, 0, 1, 1], [], []>} : vector<40x128xf32>, vector<128x32xf32>, vector<40x32xf32> -> vector<40x32xf32>
    %34 = arith.addf %31, %33 : vector<40x32xf32>
    %c0_9 = arith.constant 0 : index
    %c0_10 = arith.constant 0 : index
    %35 = vector.load %arg3[%c0_9, %c0_10] : memref<1x32xf32, #tpu.memory_space<vmem>>, vector<1x32xf32>
    %36 = vector.broadcast %35 : vector<1x32xf32> to vector<40x32xf32>
    %37 = arith.addf %34, %36 : vector<40x32xf32>
    %c0_11 = arith.constant 0 : index
    %c0_12 = arith.constant 0 : index
    %38 = vector.load %arg4[%c0_11, %c0_12] : memref<40x32xf32, #tpu.memory_space<vmem>>, vector<40x32xf32>
    tpu.vector_store %arg4[%c0_11, %c0_12], %37 {strides = array<i32>} : memref<40x32xf32, #tpu.memory_space<vmem>>, vector<40x32xf32>,
    return
  }
  func.func @transform_0(%arg0: i32) -> (i32, i32) {
    %c0_i32 = arith.constant 0 : i32
    %c0_i32_0 = arith.constant 0 : i32
    return %arg0, %c0_i32 : i32, i32
  }
  func.func @transform_1(%arg0: i32) -> (i32, i32) {
    %c0_i32 = arith.constant 0 : i32
    %c0_i32_0 = arith.constant 0 : i32
    %c0_i32_1 = arith.constant 0 : i32
    return %c0_i32, %c0_i32_0 : i32, i32
  }
  func.func @transform_2(%arg0: i32) -> (i32, i32) {
    %c0_i32 = arith.constant 0 : i32
    %c0_i32_0 = arith.constant 0 : i32
    %c0_i32_1 = arith.constant 0 : i32
    return %c0_i32, %c0_i32_0 : i32, i32
  }
  func.func @transform_3(%arg0: i32) -> (i32, i32) {
    %c0_i32 = arith.constant 0 : i32
    %c0_i32_0 = arith.constant 0 : i32
    return %arg0, %c0_i32 : i32, i32
  }
}

</mosaic_0001>

<bundles_post_ra>
// kernel: milk_item_emb.1
= control target key start
LH: loop header
LB: loop body
LE: loop exit
PB: predicated region body
PF: predicated region fallthrough
CT: control target
= control target key end

     0   :  { %s1155_s12 = smov 0   ;;  %s1157_s13 = smov 0   ;;  %s1487_s0 = inlined_call_operand.vmem [shape: f32[70,256], index: 0, kind: input, shape index: {}]   ;;  %s1488_s1 = inlined_call_operand.vmem [shape: f32[256,32], index: 1, kind: input, shape index: {}]   ;;  %s1489_s2 = inlined_call_operand.vmem [shape: f32[1,32], index: 2, kind: input, shape index: {}]   ;;  %s1490_s3 = inlined_call_operand.vmem [shape: f32[70,32], index: 3, kind: output, shape index: {}]  }
   0x1   :  { %s1159_s14 = smov 0  }
   0x2 LB: > { %s1168_s15 = sadd.s32 4294967295, %s1099_s14   ;;  %s1170_s16 = sadd.s32 1, %s1099_s14   ;;  %s1099_s14 = sphi %s1159_s14, %s1497_s14   ;;  %s1095_s13 = sphi %s1157_s13, %s1496_s13   ;;  %s1091_s12 = sphi %s1155_s12, %s1495_s12  }
   0x3   : > { %s85_s17 = ssub.s32 %s1099_s14, %s1170_s16  ;;  %s88_s18 = sadd.s32 1, %s1095_s13 }
   0x4   : > { %p86_p0 = scmp.eq.s32.totalorder %s85_s17, 0  ;;  %p98_p1 = scmp.ne.s32.totalorder %s1095_s13, %s1091_s12 }
   0x5   : > { %p99_p2 = scmp.eq.s32.totalorder %s1168_s15, 1  ;;  %p775_p3 = scmp.ge.s32.totalorder %s1099_s14, 1 }
   0x6   : > { %s1178_s19 = scalar_select %p86_p0, %s1095_s13, %s88_s18  }
   0x7   : > { %p1180_p4 = por %p99_p2, %p98_p1  ;;  %p149_p5 = scmp.lt.s32.totalorder %s1099_s14, 3 }
   0x9   : > { %p150_p6 = pnand %p775_p3, %p149_p5 }
   0xa   : > { %s1185_s21 = smul.u32 (!%p150_p6), 5, %s1168_s15 }
   0xb   : > { %153 = sbr.rel (%p150_p6) target bundleno = 455 (0x1c7), region = 32 }
   0xc   : > { %s216_s26 = smul.u32 (!%p150_p6), 40, %s1168_s15  ;;  %p184_p7 = scmp.lt.s32.totalorder (!%p150_p6), %s1185_s21, 8 }
  0x10   : > { %v210_v0 = vlaneseq  ;;  %v263_v1 = vld [vmem:[%s1488_s1 + $0x78] sm:$0xff]  ;;  %v1133_v3 = vmov 0.0   ;;  %v262_v4 = vld [vmem:[%s1488_s1 + $0x70] sm:$0xff]  ;;  %v1205_v7 = vstv %s216_s26  ;;  %v261_v8 = vld [vmem:[%s1488_s1 + $0x68] sm:$0xff]  ;;  %s185_s8 = scalar_select %p184_p7, %s1185_s21, 8  ;;  %vm1134_vm5 = vmmov 0  }
  0x11   : > { %v279_v2 = vld [vmem:[%s1488_s1 + $0xf8] sm:$0xff]  ;;  %882 = vmatprep.subr.mxu1 %v1133_v3  ;;  %835 = vmatprep.subr.mxu0 %v1133_v3  ;;  %v278_v5 = vld [vmem:[%s1488_s1 + $0xf0] sm:$0xff]  ;;  %v277_v9 = vld [vmem:[%s1488_s1 + $0xe8] sm:$0xff]  ;;  %vm532_vm6 = vcmask 261120   ;;  %s1438_s22 = scalar_lea.vmem (%p1180_p4), %s1490_s3, %s216_s26  }
  0x12   : > { %v211_v6 = vshrl.u32 %v210_v0, 7  ;;  %883 = vmatpush3.msra.mxu1 %v263_v1  ;;  %836 = vmatpush3.msra.mxu0 %v279_v2  ;;  %v260_v14 = vld [vmem:[%s1488_s1 + $0x60] sm:$0xff]  ;;  %s791_s17 = sshll.u32 %s185_s8, 4  ;;  %v259_v18 = vld [vmem:[%s1488_s1 + $0x58] sm:$0xff]  ;;  %v258_v34 = vld [vmem:[%s1488_s1 + $0x50] sm:$0xff]  ;;  %s175_s8 = sand.u32 1, %s1091_s12  }
  0x13   : > { %884 = vmatprep.subr.mxu1 %v1133_v3  ;;  %837 = vmatprep.subr.mxu0 %v1133_v3  ;;  %v276_v15 = vld [vmem:[%s1488_s1 + $0xe0] sm:$0xff]  ;;  %s1230_s23 = scalar_lea.vmem %s1487_s0, %s791_s17  ;;  %v275_v19 = vld [vmem:[%s1488_s1 + $0xd8] sm:$0xff]  ;;  %v257_v37 = vld [vmem:[%s1488_s1 + $0x48] sm:$0xff]  ;;  %s929_s9 = smul.u32 40, %s175_s8 }
  0x14   : > { %v218_v10 = vadd.s32 %v1205_v7, %v211_v6  ;;  %v212_v11 = vadd.s32 8, %v211_v6  ;;  %v213_v12 = vadd.s32 16, %v211_v6  ;;  %885 = vmatpush3.msra.mxu1 %v262_v4  ;;  %838 = vmatpush3.msra.mxu0 %v278_v5  ;;  %v214_v13 = vadd.s32 24, %v211_v6  ;;  %v200_v20 = vld [vmem:[%s1230_s23] sm:$0xff]  ;;  %v202_v21 = vld [vmem:[%s1230_s23 + $0x10] sm:$0xff]  ;;  %v201_v22 = vld [vmem:[%s1230_s23 + $0x8] sm:$0xff] }
  0x15   : > { %886 = vmatprep.subr.mxu1 %v1133_v3  ;;  %839 = vmatprep.subr.mxu0 %v1133_v3  ;;  %v215_v23 = vadd.s32 32, %v211_v6  ;;  %v203_v27 = vld [vmem:[%s1230_s23 + $0x18] sm:$0xff]  ;;  %v204_v32 = vld [vmem:[%s1230_s23 + $0x20] sm:$0xff]  ;;  %v205_v33 = vld [vmem:[%s1230_s23 + $0x28] sm:$0xff]  ;;  %s1418_s14 = scalar_lea.vmem [#allocation2], %s929_s9   ;;  %s546_s12 = ssub.s32 (%p1180_p4), 9, %s1185_s21 }
  0x16   : > { %vm223_vm0 = vcmp.lt.s32.totalorder %v218_v10, 70  ;;  %v219_v16 = vadd.s32 %v1205_v7, %v212_v11  ;;  %v220_v17 = vadd.s32 %v1205_v7, %v213_v12  ;;  %887 = vmatpush3.msra.mxu1 %v261_v8  ;;  %840 = vmatpush3.msra.mxu0 %v277_v9  ;;  %v221_v28 = vadd.s32 %v1205_v7, %v214_v13  ;;  %v206_v40 = vld [vmem:[%s1230_s23 + $0x30] sm:$0xff]  ;;  %v207_v41 = vld [vmem:[%s1230_s23 + $0x38] sm:$0xff]  ;;  %v208_v47 = vld [vmem:[%s1230_s23 + $0x40] sm:$0xff]  ;;  %p547_p8 = scmp.lt.s32.totalorder (%p1180_p4), %s546_s12, 5 }
  0x17   : > { %888 = vmatprep.subr.mxu1 %v1133_v3  ;;  %841 = vmatprep.subr.mxu0 %v1133_v3  ;;  %v1244_v24 = vsel %vm223_vm0, %v200_v20, 0.0  ;;  %v1249_v26 = vsel %vm223_vm0, %v201_v22, 0.0  ;;  %v222_v42 = vadd.s32 %v1205_v7, %v215_v23  ;;  %v209_v48 = vld [vmem:[%s1230_s23 + $0x48] sm:$0xff]  ;;  %v274_v53 = vld [vmem:[%s1488_s1 + $0xd0] sm:$0xff]  ;;  %v256_v54 = vld [vmem:[%s1488_s1 + $0x40] sm:$0xff] }
  0x18   : > { %vm224_vm1 = vcmp.lt.s32.totalorder %v219_v16, 70  ;;  %889 = vmatpush3.msra.mxu1 %v260_v14  ;;  %842 = vmatpush3.msra.mxu0 %v276_v15  ;;  %v280_v29 = vmul.f32 %v1244_v24, %v1244_v24  ;;  %vm225_vm2 = vcmp.lt.s32.totalorder %v220_v17, 70  ;;  %v305_v35 = vmul.f32 %v1249_v26, %v1249_v26  ;;  %v273_v57 = vld [vmem:[%s1488_s1 + $0xc8] sm:$0xff]  ;;  %v255_v58 = vld [vmem:[%s1488_s1 + $0x38] sm:$0xff]  ;;  %v272_v59 = vld [vmem:[%s1488_s1 + $0xc0] sm:$0xff] }
  0x19   : > { %v1246_v25 = vsel %vm224_vm1, %v202_v21, 0.0  ;;  %890 = vmatprep.subr.mxu1 %v1133_v3  ;;  %843 = vmatprep.subr.mxu0 %v1133_v3  ;;  %v1259_v31 = vsel %vm224_vm1, %v203_v27, 0.0  ;;  %v1275_v38 = vsel %vm225_vm2, %v204_v32, 0.0  ;;  %v1277_v39 = vsel %vm225_vm2, %v205_v33, 0.0  ;;  %v254_v60 = vld [vmem:[%s1488_s1 + $0x30] sm:$0xff]  ;;  %v271_v61 = vld [vmem:[%s1488_s1 + $0xb8] sm:$0xff] }
  0x1a   : > { %v281_v30 = vmul.f32 %v1246_v25, %v1246_v25  ;;  %891 = vmatpush3.msra.mxu1 %v259_v18  ;;  %844 = vmatpush3.msra.mxu0 %v275_v19  ;;  %v306_v36 = vmul.f32 %v1259_v31, %v1259_v31  ;;  %vm226_vm3 = vcmp.lt.s32.totalorder %v221_v28, 70  ;;  %v282_v43 = vmul.f32 %v1275_v38, %v1275_v38  ;;  %v253_v62 = vld [vmem:[%s1488_s1 + $0x28] sm:$0xff]  ;;  %v270_v63 = vld [vmem:[%s1488_s1 + $0xb0] sm:$0xff]  ;;  %v252_v0 = vld [vmem:[%s1488_s1 + $0x20] sm:$0xff] }
  0x1b   : > { %892 = vmatprep.subr.mxu1 %v1133_v3  ;;  %845 = vmatprep.subr.mxu0 %v1133_v3  ;;  %v307_v44 = vmul.f32 %v1277_v39, %v1277_v39  ;;  %v1287_v45 = vsel %vm226_vm3, %v206_v40, 0.0  ;;  %v1289_v46 = vsel %vm226_vm3, %v207_v41, 0.0  ;;  %vm227_vm4 = vcmp.lt.s32.totalorder %v222_v42, 70  ;;  %v269_v1 = vld [vmem:[%s1488_s1 + $0xa8] sm:$0xff]  ;;  %v251_v2 = vld [vmem:[%s1488_s1 + $0x18] sm:$0xff]  ;;  %v268_v4 = vld [vmem:[%s1488_s1 + $0xa0] sm:$0xff] }
  0x1c   : > { %285 = vadd.xlane.f32.xlu0 %v280_v29  ;;  %287 = vadd.xlane.f32.xlu1 %v281_v30  ;;  %v283_v49 = vmul.f32 %v1287_v45, %v1287_v45  ;;  %v308_v50 = vmul.f32 %v1289_v46, %v1289_v46  ;;  %v1298_v51 = vsel %vm227_vm4, %v208_v47, 0.0  ;;  %v1300_v52 = vsel %vm227_vm4, %v209_v48, 0.0  ;;  %v250_v5 = vld [vmem:[%s1488_s1 + $0x10] sm:$0xff]  ;;  %v267_v6 = vld [vmem:[%s1488_s1 + $0x98] sm:$0xff]  ;;  %v249_v7 = vld [vmem:[%s1488_s1 + $0x8] sm:$0xff] }
  0x1d   : > { %893 = vmatpush3.msra.mxu1 %v258_v34  ;;  %846 = vmatpush3.msra.mxu0 %v274_v53  ;;  %v284_v55 = vmul.f32 %v1298_v51, %v1298_v51  ;;  %v309_v56 = vmul.f32 %v1300_v52, %v1300_v52  ;;  %v266_v8 = vld [vmem:[%s1488_s1 + $0x90] sm:$0xff]  ;;  %v248_v9 = vld [vmem:[%s1488_s1] sm:$0xff]  ;;  %v265_v10 = vld [vmem:[%s1488_s1 + $0x88] sm:$0xff] }
  0x1e   : > { %894 = vmatprep.subr.mxu1 %v1133_v3  ;;  %847 = vmatprep.subr.mxu0 %v1133_v3  ;;  %v264_v11 = vld [vmem:[%s1488_s1 + $0x80] sm:$0xff] }
  0x1f   : > { %895 = vmatpush3.msra.mxu1 %v257_v37  ;;  %848 = vmatpush3.msra.mxu0 %v273_v57  ;;  %v778_v57 = vld [vmem:[%s1489_s2] ss:$0 sm:$0xff] }
  0x20   : > { %310 = vadd.xlane.f32.xlu0 %v305_v35  ;;  %312 = vadd.xlane.f32.xlu1 %v306_v36 }
  0x21   : > { %896 = vmatprep.subr.mxu1 %v1133_v3  ;;  %849 = vmatprep.subr.mxu0 %v1133_v3 }
  0x22   : > { %897 = vmatpush3.msra.mxu1 %v256_v54  ;;  %850 = vmatpush3.msra.mxu0 %v272_v59 }
  0x23   : > { %898 = vmatprep.subr.mxu1 %v1133_v3  ;;  %851 = vmatprep.subr.mxu0 %v1133_v3 }
  0x24   : > { %289 = vadd.xlane.f32.xlu0 %v282_v43  ;;  %314 = vadd.xlane.f32.xlu1 %v307_v44 }
  0x25   : > { %899 = vmatpush3.msra.mxu1 %v255_v58  ;;  %852 = vmatpush3.msra.mxu0 %v271_v61 }
  0x26   : > { %900 = vmatprep.subr.mxu1 %v1133_v3  ;;  %853 = vmatprep.subr.mxu0 %v1133_v3 }
  0x27   : > { %901 = vmatpush3.msra.mxu1 %v254_v60  ;;  %854 = vmatpush3.msra.mxu0 %v270_v63 }
  0x28   : > { %291 = vadd.xlane.f32.xlu0 %v283_v49  ;;  %316 = vadd.xlane.f32.xlu1 %v308_v50 }
  0x29   : > { %902 = vmatprep.subr.mxu1 %v1133_v3  ;;  %855 = vmatprep.subr.mxu0 %v1133_v3 }
  0x2a   : > { %903 = vmatpush3.msra.mxu1 %v253_v62  ;;  %856 = vmatpush3.msra.mxu0 %v269_v1 }
  0x2b   : > { %904 = vmatprep.subr.mxu1 %v1133_v3  ;;  %857 = vmatprep.subr.mxu0 %v1133_v3 }
  0x2c   : > { %293 = vadd.xlane.f32.xlu0 %v284_v55  ;;  %318 = vadd.xlane.f32.xlu1 %v309_v56 }
  0x2d   : > { %905 = vmatpush3.msra.mxu1 %v252_v0  ;;  %858 = vmatpush3.msra.mxu0 %v268_v4 }
  0x2e   : > { %906 = vmatprep.subr.mxu1 %v1133_v3  ;;  %859 = vmatprep.subr.mxu0 %v1133_v3 }
  0x2f   : > { %907 = vmatpush3.msra.mxu1 %v251_v2  ;;  %860 = vmatpush3.msra.mxu0 %v267_v6 }
  0x30   : > { %908 = vmatprep.subr.mxu1 %v1133_v3  ;;  %861 = vmatprep.subr.mxu0 %v1133_v3 }
  0x31   : > { %909 = vmatpush3.msra.mxu1 %v250_v5  ;;  %862 = vmatpush3.msra.mxu0 %v266_v8 }
  0x32   : > { %910 = vmatprep.subr.mxu1 %v1133_v3  ;;  %914 = vmatprep.mubr.msk.f32.mxu1 %vm1134_vm5, %v1133_v3 }
  0x33   : > { %911 = vmatpush3.msra.mxu1 %v249_v7  ;;  %863 = vmatprep.subr.mxu0 %v1133_v3 }
  0x34   : > { %912 = vmatprep.subr.mxu1 %v1133_v3  ;;  %864 = vmatpush3.msra.mxu0 %v265_v10 }
  0x35   : > { %913 = vmatpush3.msra.mxu1 %v248_v9  ;;  %867 = vmatprep.mubr.msk.f32.mxu0 %vm1134_vm5, %v1133_v3 }
  0x36   : > { %865 = vmatprep.subr.mxu0 %v1133_v3 }
  0x37   : > { %866 = vmatpush3.msra.mxu0 %v264_v11 }
  0xa5   : > { %v286_v12 = vpop.xlane.xlu0 %285  ;;  %v288_v13 = vpop.xlane.xlu1 %287 }
  0xa6   : > { %v295_v14 = vmax.f32 %v286_v12, 1e-24  ;;  %v296_v15 = vmax.f32 %v288_v13, 1e-24 }
  0xa8   : > { %1021 = vrsqrt.f32 %v295_v14 }
  0xa9   : > { %1023 = vrsqrt.f32 %v296_v15  ;;  %v311_v16 = vpop.xlane.xlu0 %310  ;;  %v313_v17 = vpop.xlane.xlu1 %312 }
  0xaa   : > { %v320_v18 = vmax.f32 %v311_v16, 1e-24  ;;  %v321_v19 = vmax.f32 %v313_v17, 1e-24 }
  0xac   : > { %1025 = vrsqrt.f32 %v320_v18 }
  0xad   : > { %1027 = vrsqrt.f32 %v321_v19  ;;  %v290_v20 = vpop.xlane.xlu0 %289  ;;  %v315_v21 = vpop.xlane.xlu1 %314 }
  0xae   : > { %v297_v22 = vmax.f32 %v290_v20, 1e-24  ;;  %v322_v23 = vmax.f32 %v315_v21, 1e-24 }
  0xb0   : > { %1029 = vrsqrt.f32 %v297_v22 }
  0xb1   : > { %1031 = vrsqrt.f32 %v322_v23  ;;  %v292_v27 = vpop.xlane.xlu0 %291  ;;  %v317_v28 = vpop.xlane.xlu1 %316 }
  0xb2   : > { %v298_v29 = vmax.f32 %v292_v27, 1e-24  ;;  %v323_v30 = vmax.f32 %v317_v28, 1e-24 }
  0xb4   : > { %1033 = vrsqrt.f32 %v298_v29 }
  0xb5   : > { %v1022_v32 = vpop.eup %1021  ;;  %1035 = vrsqrt.f32 %v323_v30  ;;  %v294_v33 = vpop.xlane.xlu0 %293 }
  0xb6   : > { %v319_v34 = vpop.xlane.xlu1 %318  ;;  %v1024_v35 = vpop.eup %1023  ;;  %v299_v36 = vmax.f32 %v294_v33, 1e-24  ;;  %v330_v37 = vmul.f32 %v1022_v32, %v1244_v24 }
  0xb7   : > { %v324_v40 = vmax.f32 %v319_v34, 1e-24  ;;  %v331_v41 = vmul.f32 %v1024_v35, %v1246_v25 }
  0xb8   : > { %1037 = vrsqrt.f32 %v299_v36  ;;  %915 = vmatmul.mubr.f32.vlgmr.msra.gmra.mxu1 %v330_v37 }
  0xb9   : > { %v1026_v42 = vpop.eup %1025  ;;  %1039 = vrsqrt.f32 %v324_v40  ;;  %917 = vmatprep.mubr.msk.f32.mxu1 %vm1134_vm5, %v1133_v3 }
  0xba   : > { %v1028_v43 = vpop.eup %1027  ;;  %v335_v44 = vmul.f32 %v1026_v42, %v1249_v26 }
  0xbb   : > { %v336_v47 = vmul.f32 %v1028_v43, %v1259_v31 }
  0xbc   : > { %868 = vmatmul.mubr.f32.vlgmr.msra.gmra.mxu0 %v335_v44  ;;  %918 = vmatmul.mubr.f32.gmra.mxu1 %v331_v41 }
  0xbd   : > { %v1030_v48 = vpop.eup %1029  ;;  %870 = vmatprep.mubr.msk.f32.mxu0 %vm1134_vm5, %v1133_v3  ;;  %920 = vmatprep.mubr.msk.f32.mxu1 %vm1134_vm5, %v1133_v3 }
  0xbe   : > { %v1032_v24 = vpop.eup %1031  ;;  %v332_v25 = vmul.f32 %v1030_v48, %v1275_v38 }
  0xbf   : > { %v337_v49 = vmul.f32 %v1032_v24, %v1277_v39 }
  0xc0   : > { %871 = vmatmul.mubr.f32.gmra.mxu0 %v336_v47  ;;  %921 = vmatmul.mubr.f32.gmra.mxu1 %v332_v25 }
  0xc1   : > { %v1034_v50 = vpop.eup %1033  ;;  %873 = vmatprep.mubr.msk.f32.mxu0 %vm1134_vm5, %v1133_v3  ;;  %923 = vmatprep.mubr.msk.f32.mxu1 %vm1134_vm5, %v1133_v3 }
  0xc2   : > { %v1036_v26 = vpop.eup %1035  ;;  %v333_v31 = vmul.f32 %v1034_v50, %v1287_v45 }
  0xc3   : > { %v338_v53 = vmul.f32 %v1036_v26, %v1289_v46 }
  0xc4   : > { %874 = vmatmul.mubr.f32.gmra.mxu0 %v337_v49  ;;  %924 = vmatmul.mubr.f32.gmra.mxu1 %v333_v31 }
  0xc5   : > { %v1038_v38 = vpop.eup %1037  ;;  %876 = vmatprep.mubr.msk.f32.mxu0 %vm1134_vm5, %v1133_v3  ;;  %926 = vmatprep.mubr.msk.f32.mxu1 %vm1134_vm5, %v1133_v3 }
  0xc6   : > { %v1040_v39 = vpop.eup %1039  ;;  %v334_v54 = vmul.f32 %v1038_v38, %v1298_v51 }
  0xc7   : > { %v339_v55 = vmul.f32 %v1040_v39, %v1300_v52 }
  0xc8   : > { %877 = vmatmul.mubr.f32.gmra.mxu0 %v338_v53  ;;  %927 = vmatmul.mubr.f32.gmra.mxu1 %v334_v54 }
  0xc9   : > { %879 = vmatprep.mubr.msk.f32.mxu0 %vm1134_vm5, %v1133_v3 }
  0xcc   : > { %880 = vmatmul.mubr.f32.gmra.mxu0 %v339_v55 }
 0x178   : > { %v496_v45 = vpop.f32.mrf.mxu1 }
 0x17a   : > { %v916_v46 = vpop.f32.mrf.mxu1 }
 0x17c   : > { %v406_v56 = vpop.f32.mrf.mxu0  ;;  %v501_v58 = vpop.f32.mrf.mxu1 }
 0x17d   : > { %v497_v59 = vadd.f32 %v496_v45, %v406_v56 }
 0x17e   : > { %v869_v51 = vpop.f32.mrf.mxu0  ;;  %v919_v60 = vpop.f32.mrf.mxu1 }
 0x17f   : > { %v527_v61 = vadd.f32 %v778_v57, %v497_v59 }
 0x180   : > { %v411_v52 = vpop.f32.mrf.mxu0  ;;  %v506_v62 = vpop.f32.mrf.mxu1 }
 0x181   : > { %533 = vst.msk [vmem:[%s1418_s14] sm:$0xff] %vm532_vm6, %v527_v61  ;;  %v502_v3 = vadd.f32 %v501_v58, %v411_v52 }
 0x182   : > { %v872_v63 = vpop.f32.mrf.mxu0  ;;  %v922_v0 = vpop.f32.mrf.mxu1 }
 0x183   : > { %v528_v1 = vadd.f32 %v778_v57, %v502_v3 }
 0x184   : > { %v416_v2 = vpop.f32.mrf.mxu0  ;;  %v511_v4 = vpop.f32.mrf.mxu1 }
 0x185   : > { %534 = vst.msk [vmem:[%s1418_s14 + $0x8] sm:$0xff] %vm532_vm6, %v528_v1  ;;  %v507_v5 = vadd.f32 %v506_v62, %v416_v2 }
 0x186   : > { %v875_v6 = vpop.f32.mrf.mxu0  ;;  %v925_v7 = vpop.f32.mrf.mxu1 }
 0x187   : > { %v529_v8 = vadd.f32 %v778_v57, %v507_v5 }
 0x188   : > { %v421_v9 = vpop.f32.mrf.mxu0  ;;  %v516_v10 = vpop.f32.mrf.mxu1 }
 0x189   : > { %535 = vst.msk [vmem:[%s1418_s14 + $0x10] sm:$0xff] %vm532_vm6, %v529_v8  ;;  %v512_v11 = vadd.f32 %v511_v4, %v421_v9 }
 0x18a   : > { %v878_v12 = vpop.f32.mrf.mxu0  ;;  %v928_v13 = vpop.f32.mrf.mxu1 }
 0x18b   : > { %v530_v14 = vadd.f32 %v778_v57, %v512_v11 }
 0x18c   : > { %v426_v15 = vpop.f32.mrf.mxu0 }
 0x18d   : > { %536 = vst.msk [vmem:[%s1418_s14 + $0x18] sm:$0xff] %vm532_vm6, %v530_v14  ;;  %v517_v16 = vadd.f32 %v516_v10, %v426_v15  ;;  %544 = sbr.rel (!%p1180_p4) target bundleno = 455 (0x1c7), region = 36 }
 0x18e   : > { %v881_v17 = vpop.f32.mrf.mxu0 }
 0x18f   : > { %v531_v18 = vadd.f32 %v778_v57, %v517_v16 }
 0x191   : > { %537 = vst.msk [vmem:[%s1418_s14 + $0x20] sm:$0xff] %vm532_vm6, %v531_v18 }
 0x192   : > { %s1499_s12 = smov (!%p547_p8, %s546_s12), 5 }
 0x193   : > { %s779_s23 = sshll.u32 %s1499_s12, 7 }
 0x194   : > { %p782_p9 = scmp.eq.s32.totalorder %s779_s23, 0 }
 0x195   : > { %1041 = sdivrem.u32 (!%p782_p9), %s1499_s12, 5 }
 0x196   : > { %555 = sbr.rel (%p782_p9) target bundleno = 455 (0x1c7), region = 40 }
 0x19e   : > { %s1444_s20 = spop.drf %1041 }
 0x19f   : > { %p783_p10 = scmp.le.s32.totalorder %s1444_s20, 0 }
 0x1a0   : > { %s1492_s15 = smov (!%p783_p10), %s1438_s22  ;;  %s1493_s21 = smov (!%p783_p10), %s1418_s14 }
 0x1a1   : > { %728 = sbr.rel (%p783_p10) target bundleno = 430 (0x1ae), region = 116  ;;  %s1453_s26 = smov (!%p783_p10), 0  }
 0x1a2   : > { %s1455_s24 = smov (!%p783_p10), 0  }
 0x1a6 LB: >> { %v628_v19 = vld [vmem:[%s1107_s21] sm:$0xff]  ;;  %v630_v20 = vld [vmem:[%s1107_s21 + $0x8] sm:$0xff]  ;;  %v632_v21 = vld [vmem:[%s1107_s21 + $0x10] sm:$0xff]  ;;  %s638_s25 = sadd.s32 1, %s1111_s26  ;;  %s622_s24 = sadd.s32 1, %s1115_s24   ;;  %s1115_s24 = sphi %s1455_s24, %s622_s24   ;;  %s1111_s26 = sphi %s1453_s26, %s1494_s26   ;;  %s1107_s21 = sphi %s1493_s21, %s643_s21   ;;  %s1103_s15 = sphi %s1492_s15, %s644_s15  }
 0x1a7   : >> { %629 = vst [vmem:[%s1103_s15] sm:$0xff] %v628_v19  ;;  %631 = vst [vmem:[%s1103_s15 + $0x8] sm:$0xff] %v630_v20  ;;  %v634_v22 = vld [vmem:[%s1107_s21 + $0x18] sm:$0xff]  ;;  %v636_v23 = vld [vmem:[%s1107_s21 + $0x20] sm:$0xff]  ;;  %p639_p11 = scmp.ge.s32.totalorder %s638_s25, %s1444_s20  ;;  %p621_p12 = scmp.ge.s32.totalorder %s622_s24, %s1444_s20 }
 0x1a8   : >> { %633 = vst [vmem:[%s1103_s15 + $0x10] sm:$0xff] %v632_v21  ;;  %635 = vst [vmem:[%s1103_s15 + $0x18] sm:$0xff] %v634_v22 }
 0x1a9   : >> { %637 = vst [vmem:[%s1103_s15 + $0x20] sm:$0xff] %v636_v23  ;;  %s1501_s25 = smov (%p639_p11, %s638_s25), 0  ;;  %624 = sbr.rel (!%p621_p12) target bundleno = 422 (0x1a6), region = 122 }
 0x1aa   : >> { %s641_s27 = smul.u32 40, %s1501_s25  ;;  %s1494_s26 = smov %s1501_s25 }
 0x1ac   : >> { %s643_s21 = scalar_lea.vmem %s1418_s14, %s641_s27 [#allocation2]   ;;  %s644_s15 = scalar_lea.vmem %s1438_s22, %s641_s27  }
 0x1ae PF: > { %1043 = sdivrem.u32 %s1499_s12, 5 }
 0x1af   : > { %s784_s28 = smul.u32 40, %s1444_s20 }
 0x1b1   : > { %s649_s29 = scalar_lea.vmem %s1418_s14, %s784_s28 [#allocation2]   ;;  %s651_s30 = scalar_lea.vmem %s1438_s22, %s784_s28  }
 0x1b7   : > { %s1044_s4 = spop.drf %1043 }
 0x1b8   : > { %p786_p13 = scmp.le.s32.totalorder %s1044_s4, 0 }
 0x1b9   : > { %s1117_s5 = smov (!%p786_p13), %s651_s30   ;;  %s1121_s6 = smov (!%p786_p13), %s649_s29  }
 0x1ba   : > { %742 = sbr.rel (%p786_p13) target bundleno = 455 (0x1c7), region = 127  ;;  %s1125_s7 = smov (!%p786_p13), 0  }
 0x1bb   : > { %s1129_s8 = smov (!%p786_p13), 0  }
 0x1bf LB: >> { %v661_v27 = vld [vmem:[%s1123_s6] sm:$0xff]  ;;  %s663_s9 = sadd.s32 1, %s1127_s7  ;;  %s655_s8 = sadd.s32 1, %s1131_s8   ;;  %s1131_s8 = sphi %s1129_s8, %s655_s8   ;;  %s1127_s7 = sphi %s1125_s7, %s1126_s7   ;;  %s1123_s6 = sphi %s1121_s6, %s668_s6   ;;  %s1119_s5 = sphi %s1117_s5, %s669_s5  }
 0x1c0   : >> { %662 = vst [vmem:[%s1119_s5] sm:$0xff] %v661_v27  ;;  %p664_p0 = scmp.ge.s32.totalorder %s663_s9, %s1044_s4  ;;  %p654_p1 = scmp.ge.s32.totalorder %s655_s8, %s1044_s4 }
 0x1c2   : >> { %s1503_s9 = smov (%p664_p0, %s663_s9), 0  ;;  %657 = sbr.rel (!%p654_p1) target bundleno = 447 (0x1bf), region = 133 }
 0x1c3   : >> { %s787_s10 = sshll.u32 %s1503_s9, 3  ;;  %s1126_s7 = smov %s1503_s9  }
 0x1c4   : >> { %s668_s6 = scalar_lea.vmem %s649_s29, %s787_s10 [#allocation2]   ;;  %s669_s5 = scalar_lea.vmem %s651_s30, %s787_s10  }
 0x1c7 PF: > { %p10_p2 = scmp.ge.s32.totalorder %s1170_s16, 4   ;;  %s1495_s12 = smov %s1095_s13 }
 0x1c8   : > { %s1496_s13 = smov %s1178_s19  ;;  %s1497_s14 = smov %s1170_s16 }
 0x1c9   :  { %12 = sbr.rel (!%p10_p2) target bundleno = 2 (0x2), region = 144 }

</bundles_post_ra>
